<compile_context>
chip_gen: v7x
topology: tpu7x:2x2x1
jax: 0.10.0
libtpu: 0.0.40
codegen_flags: <defaults>
</compile_context>

<pallas_src>
import functools

import jax
import jax.numpy as jnp
from jax import lax
from jax.experimental import pallas as pl
from jax.experimental.pallas import tpu as pltpu


def _round_up(x, m):
    return (x + m - 1) // m * m


def _mlp_kernel(num_hidden, lane_dense, x1_ref, x2_ref, *refs):
    """refs = (w0a, w0b, b0, w1, b1, ..., w_out, b_out, out_ref).

    Hidden-layer weights arrive pre-cast to bf16 (MXU-native); biases and the
    final layer stay f32.  All matmul accumulation is f32.
    """
    out_ref = refs[-1]
    p = refs[:-1]
    f32, bf16 = jnp.float32, jnp.bfloat16

    # ---- layer 0: fused concat ------------------------------------------
    # relu(concat(x1, x2) @ W0 + b0) == relu(x1 @ W0[:in] + x2 @ W0[in:] + b0)
    w0a, w0b, b0 = p[0], p[1], p[2]
    h = jnp.dot(x1_ref[...].astype(bf16), w0a[...], preferred_element_type=f32)
    h = h + jnp.dot(x2_ref[...].astype(bf16), w0b[...], preferred_element_type=f32)
    h = jnp.maximum(h + b0[...], 0.0)

    # ---- remaining hidden layers -----------------------------------------
    idx = 3
    for _ in range(1, num_hidden):
        w, b = p[idx], p[idx + 1]
        idx += 2
        h = jnp.dot(h.astype(bf16), w[...], preferred_element_type=f32) + b[...]
        h = jnp.maximum(h, 0.0)

    # ---- output layer ------------------------------------------------------
    w_last, b_last = p[idx], p[idx + 1]
    if lane_dense:
        # out_features == 1: (1, H) contracted against (TILE_B, H) on the last
        # dims -> (1, TILE_B).  Batch lands in lanes: fully lane-dense store
        # instead of a masked last-dim-1 store.
        y = lax.dot_general(
            w_last[...], h,
            dimension_numbers=(((1,), (1,)), ((), ())),
            preferred_element_type=f32)
        out_ref[...] = (y + b_last[...]).astype(out_ref.dtype)
    else:
        y = jnp.dot(h.astype(bf16), w_last[...], preferred_element_type=f32)
        out_ref[...] = (y + b_last[...]).astype(out_ref.dtype)


def discriminator_forward(x1, x2, params, *, tile_b_max=1024):
    """Pallas forward of Discriminator: ReLU-MLP over concat([x1, x2], dim=1).

    params: list of (W, b) with W: (F_in, F_out), b: (1, F_out); the first W's
    F_in must equal x1.shape[1] + x2.shape[1].
    """
    assert len(params) >= 2, "need >=1 hidden layer plus the output layer"
    num_hidden = len(params) - 1
    batch, in_features = x1.shape
    noise_features = x2.shape[1]
    out_features = params[-1][0].shape[1]
    lane_dense = out_features == 1

    # Batch tiling: lane-dense output wants TILE_B % 128 == 0.  Cap at
    # tile_b_max (default 1024): with these narrow feature dims even the
    # largest double-buffered activation tile is ~hundreds of KiB, far below
    # VMEM limits on v5e / v6e / v7x, and bigger tiles amortize per-grid-step
    # overhead.
    tile_b = min(tile_b_max, _round_up(max(batch, 1), 128))
    b_pad = _round_up(batch, tile_b)
    num_tiles = b_pad // tile_b
    if b_pad != batch:
        x1 = jnp.pad(x1, ((0, b_pad - batch), (0, 0)))
        x2 = jnp.pad(x2, ((0, b_pad - batch), (0, 0)))

    # Flatten parameters: split W0 so the concat fuses into layer 0; cast the
    # hidden weights to bf16 once (halves weight DMA bytes, MXU-native feed).
    w0, b0 = params[0]
    flat = [w0[:in_features].astype(jnp.bfloat16),
            w0[in_features:].astype(jnp.bfloat16),
            b0.astype(jnp.float32)]
    for w, b in params[1:num_hidden]:
        flat += [w.astype(jnp.bfloat16), b.astype(jnp.float32)]
    w_out, b_out = params[-1]
    if lane_dense:
        flat += [w_out.T.astype(jnp.float32), b_out.astype(jnp.float32)]
    else:
        flat += [w_out.astype(jnp.bfloat16), b_out.astype(jnp.float32)]

    in_specs = [
        pl.BlockSpec((tile_b, in_features), lambda i: (i, 0)),
        pl.BlockSpec((tile_b, noise_features), lambda i: (i, 0)),
    ]
    # Weights/biases: full-array blocks with a constant index_map -> they stay
    # VMEM-resident across the whole batch grid (no re-DMA per tile).
    in_specs += [pl.BlockSpec(a.shape, lambda i: (0, 0)) for a in flat]

    if lane_dense:
        out_shape = jax.ShapeDtypeStruct((1, b_pad), x1.dtype)
        out_spec = pl.BlockSpec((1, tile_b), lambda i: (0, i))
    else:
        out_shape = jax.ShapeDtypeStruct((b_pad, out_features), x1.dtype)
        out_spec = pl.BlockSpec((tile_b, out_features), lambda i: (i, 0))

    kernel = functools.partial(_mlp_kernel, num_hidden, lane_dense)
    y = pl.pallas_call(
        kernel,
        out_shape=out_shape,
        grid=(num_tiles,),
        in_specs=in_specs,
        out_specs=out_spec,
        compiler_params=pltpu.CompilerParams(
            dimension_semantics=("parallel",),      # megacore-shard batch tiles
            vmem_limit_bytes=32 * 1024 * 1024),
    )(x1, x2, *flat)

    if lane_dense:
        return y.reshape(b_pad)[:batch]             # == .squeeze(dim=1)
    return y[:batch]                                # squeeze(dim=1) is a no-op


def init_params(key, num_layers, in_features, noise_features, hidden_features,
                out_features):
    """Deterministic init mirroring nn.Linear's U(-1/sqrt(fan_in), 1/sqrt(fan_in))."""
    dim_list = [in_features + noise_features] + [hidden_features] * num_layers
    dims = list(zip(dim_list, dim_list[1:])) + [(hidden_features, out_features)]
    params = []
    for (fan_in, fan_out) in dims:
        key, kw, kb = jax.random.split(key, 3)
        bound = 1.0 / (fan_in ** 0.5)
        w = jax.random.uniform(kw, (fan_in, fan_out), jnp.float32, -bound, bound)
        b = jax.random.uniform(kb, (1, fan_out), jnp.float32, -bound, bound)
        params.append((w, b))
    return params


def _reference(x1, x2, params):
    """Pure-JAX reference mirroring the kernel's numerics (bf16 hidden dots)."""
    h = jnp.concatenate([x1, x2], axis=1)
    for w, b in params[:-1]:
        h = jnp.dot(h.astype(jnp.bfloat16), w.astype(jnp.bfloat16),
                    preferred_element_type=jnp.float32) + b
        h = jnp.maximum(h, 0.0)
    w, b = params[-1]
    h = jnp.dot(h, w, preferred_element_type=jnp.float32) + b
    if w.shape[1] == 1:
        h = jnp.squeeze(h, axis=1)
    return h


if __name__ == "__main__":
    # Small shapes consistent with the module's constructor.
    num_layers = 2
    in_features = 24
    noise_features = 8
    hidden_features = 32
    out_features = 1
    batch = 8

    key = jax.random.PRNGKey(0)
    k1, k2, kp = jax.random.split(key, 3)

    # x1 carries `in_features`, x2 carries `noise_features`; concatenated they
    # match the model's input width (in_features + noise_features).
    x1 = jax.random.normal(k1, (batch, in_features), jnp.float32)
    x2 = jax.random.normal(k2, (batch, noise_features), jnp.float32)

    params = init_params(kp, num_layers, in_features, noise_features,
                         hidden_features, out_features)

    out = jax.block_until_ready(discriminator_forward(x1, x2, params))
    ref = _reference(x1, x2, params)

    assert out.shape == (batch,), out.shape
    assert jnp.allclose(out, ref, atol=2e-3, rtol=2e-3), "mismatch vs reference"

    print("KERNEL_OK")
</pallas_src>

<mosaic_0001>
module attributes {stable_mosaic.version = 11 : i64} {
  func.func @_mlp_kernel(%arg0: i32, %arg1: memref<128x24xf32, #tpu.memory_space<vmem>>, %arg2: memref<128x8xf32, #tpu.memory_space<vmem>>, %arg3: memref<24x32xbf16, #tpu.memory_space<vmem>>, %arg4: memref<8x32xbf16, #tpu.memory_space<vmem>>, %arg5: memref<1x32xf32, #tpu.memory_space<vmem>>, %arg6: memref<32x32xbf16, #tpu.memory_space<vmem>>, %arg7: memref<1x32xf32, #tpu.memory_space<vmem>>, %arg8: memref<1x32xf32, #tpu.memory_space<vmem>>, %arg9: memref<1x1xf32, #tpu.memory_space<vmem>>, %arg10: memref<1x128xf32, #tpu.memory_space<vmem>>) attributes {dimension_semantics = [#tpu.dimension_semantics<parallel>], iteration_bounds = array<i64: 1>, scalar_prefetch = 0 : i64, scratch_operands = 0 : i64, tpu.core_type = #tpu.core_type<tc>, window_params = [{transform_indices = @transform_0, window_bounds = array<i64: 128, 24>}, {transform_indices = @transform_1, window_bounds = array<i64: 128, 8>}, {pipeline_mode = #tpu.pipeline_mode<synchronous>, transform_indices = @transform_2, window_bounds = array<i64: 24, 32>}, {pipeline_mode = #tpu.pipeline_mode<synchronous>, transform_indices = @transform_3, window_bounds = array<i64: 8, 32>}, {pipeline_mode = #tpu.pipeline_mode<synchronous>, transform_indices = @transform_4, window_bounds = array<i64: 1, 32>}, {pipeline_mode = #tpu.pipeline_mode<synchronous>, transform_indices = @transform_5, window_bounds = array<i64: 32, 32>}, {pipeline_mode = #tpu.pipeline_mode<synchronous>, transform_indices = @transform_6, window_bounds = array<i64: 1, 32>}, {pipeline_mode = #tpu.pipeline_mode<synchronous>, transform_indices = @transform_7, window_bounds = array<i64: 1, 32>}, {pipeline_mode = #tpu.pipeline_mode<synchronous>, transform_indices = @transform_8, window_bounds = array<i64: 1, 1>}, {transform_indices = @transform_9, window_bounds = array<i64: 1, 128>}]} {
    %c0 = arith.constant 0 : index
    %c0_0 = arith.constant 0 : index
    %0 = vector.load %arg1[%c0, %c0_0] : memref<128x24xf32, #tpu.memory_space<vmem>>, vector<128x24xf32>
    %1 = arith.truncf %0 : vector<128x24xf32> to vector<128x24xbf16>
    %c0_1 = arith.constant 0 : index
    %c0_2 = arith.constant 0 : index
    %2 = vector.load %arg3[%c0_1, %c0_2] : memref<24x32xbf16, #tpu.memory_space<vmem>>, vector<24x32xbf16>
    %cst = arith.constant dense<0.000000e+00> : vector<128x32xf32>
    %3 = tpu.matmul %1, %2, %cst {dimension_numbers = #tpu.dot_dimension_numbers<[1], [0], [0], [1], [0, 0, 1, 1], [], []>} : vector<128x24xbf16>, vector<24x32xbf16>, vector<128x32xf32> -> vector<128x32xf32>
    %c0_3 = arith.constant 0 : index
    %c0_4 = arith.constant 0 : index
    %4 = vector.load %arg2[%c0_3, %c0_4] : memref<128x8xf32, #tpu.memory_space<vmem>>, vector<128x8xf32>
    %5 = arith.truncf %4 : vector<128x8xf32> to vector<128x8xbf16>
    %c0_5 = arith.constant 0 : index
    %c0_6 = arith.constant 0 : index
    %6 = vector.load %arg4[%c0_5, %c0_6] : memref<8x32xbf16, #tpu.memory_space<vmem>>, vector<8x32xbf16>
    %cst_7 = arith.constant dense<0.000000e+00> : vector<128x32xf32>
    %7 = tpu.matmul %5, %6, %cst_7 {dimension_numbers = #tpu.dot_dimension_numbers<[1], [0], [0], [1], [0, 0, 1, 1], [], []>} : vector<128x8xbf16>, vector<8x32xbf16>, vector<128x32xf32> -> vector<128x32xf32>
    %8 = arith.addf %3, %7 : vector<128x32xf32>
    %c0_8 = arith.constant 0 : index
    %c0_9 = arith.constant 0 : index
    %9 = vector.load %arg5[%c0_8, %c0_9] : memref<1x32xf32, #tpu.memory_space<vmem>>, vector<1x32xf32>
    %10 = vector.broadcast %9 : vector<1x32xf32> to vector<128x32xf32>
    %11 = arith.addf %8, %10 : vector<128x32xf32>
    %cst_10 = arith.constant 0.000000e+00 : f32
    %12 = vector.broadcast %cst_10 : f32 to vector<128x32xf32>
    %13 = arith.maximumf %11, %12 : vector<128x32xf32>
    %14 = arith.truncf %13 : vector<128x32xf32> to vector<128x32xbf16>
    %c0_11 = arith.constant 0 : index
    %c0_12 = arith.constant 0 : index
    %15 = vector.load %arg6[%c0_11, %c0_12] : memref<32x32xbf16, #tpu.memory_space<vmem>>, vector<32x32xbf16>
    %cst_13 = arith.constant dense<0.000000e+00> : vector<128x32xf32>
    %16 = tpu.matmul %14, %15, %cst_13 {dimension_numbers = #tpu.dot_dimension_numbers<[1], [0], [0], [1], [0, 0, 1, 1], [], []>} : vector<128x32xbf16>, vector<32x32xbf16>, vector<128x32xf32> -> vector<128x32xf32>
    %c0_14 = arith.constant 0 : index
    %c0_15 = arith.constant 0 : index
    %17 = vector.load %arg7[%c0_14, %c0_15] : memref<1x32xf32, #tpu.memory_space<vmem>>, vector<1x32xf32>
    %18 = vector.broadcast %17 : vector<1x32xf32> to vector<128x32xf32>
    %19 = arith.addf %16, %18 : vector<128x32xf32>
    %cst_16 = arith.constant 0.000000e+00 : f32
    %20 = vector.broadcast %cst_16 : f32 to vector<128x32xf32>
    %21 = arith.maximumf %19, %20 : vector<128x32xf32>
    %c0_17 = arith.constant 0 : index
    %c0_18 = arith.constant 0 : index
    %22 = vector.load %arg8[%c0_17, %c0_18] : memref<1x32xf32, #tpu.memory_space<vmem>>, vector<1x32xf32>
    %cst_19 = arith.constant dense<0.000000e+00> : vector<1x128xf32>
    %23 = tpu.matmul %22, %21, %cst_19 {dimension_numbers = #tpu.dot_dimension_numbers<[1], [1], [0], [0], [0, 0, 1, 0], [], []>} : vector<1x32xf32>, vector<128x32xf32>, vector<1x128xf32> -> vector<1x128xf32>
    %c0_20 = arith.constant 0 : index
    %c0_21 = arith.constant 0 : index
    %24 = vector.load %arg9[%c0_20, %c0_21] : memref<1x1xf32, #tpu.memory_space<vmem>>, vector<1x1xf32>
    %25 = vector.broadcast %24 : vector<1x1xf32> to vector<1x128xf32>
    %26 = arith.addf %23, %25 : vector<1x128xf32>
    %c0_22 = arith.constant 0 : index
    %c0_23 = arith.constant 0 : index
    %27 = vector.load %arg10[%c0_22, %c0_23] : memref<1x128xf32, #tpu.memory_space<vmem>>, vector<1x128xf32>
    tpu.vector_store %arg10[%c0_22, %c0_23], %26 {strides = array<i32>} : memref<1x128xf32, #tpu.memory_space<vmem>>, vector<1x128xf32>,
    return
  }
  func.func @transform_0(%arg0: i32) -> (i32, i32) {
    %c0_i32 = arith.constant 0 : i32
    %c0_i32_0 = arith.constant 0 : i32
    return %arg0, %c0_i32 : i32, i32
  }
  func.func @transform_1(%arg0: i32) -> (i32, i32) {
    %c0_i32 = arith.constant 0 : i32
    %c0_i32_0 = arith.constant 0 : i32
    return %arg0, %c0_i32 : i32, i32
  }
  func.func @transform_2(%arg0: i32) -> (i32, i32) {
    %c0_i32 = arith.constant 0 : i32
    %c0_i32_0 = arith.constant 0 : i32
    %c0_i32_1 = arith.constant 0 : i32
    return %c0_i32, %c0_i32_0 : i32, i32
  }
  func.func @transform_3(%arg0: i32) -> (i32, i32) {
    %c0_i32 = arith.constant 0 : i32
    %c0_i32_0 = arith.constant 0 : i32
    %c0_i32_1 = arith.constant 0 : i32
    return %c0_i32, %c0_i32_0 : i32, i32
  }
  func.func @transform_4(%arg0: i32) -> (i32, i32) {
    %c0_i32 = arith.constant 0 : i32
    %c0_i32_0 = arith.constant 0 : i32
    %c0_i32_1 = arith.constant 0 : i32
    return %c0_i32, %c0_i32_0 : i32, i32
  }
  func.func @transform_5(%arg0: i32) -> (i32, i32) {
    %c0_i32 = arith.constant 0 : i32
    %c0_i32_0 = arith.constant 0 : i32
    %c0_i32_1 = arith.constant 0 : i32
    return %c0_i32, %c0_i32_0 : i32, i32
  }
  func.func @transform_6(%arg0: i32) -> (i32, i32) {
    %c0_i32 = arith.constant 0 : i32
    %c0_i32_0 = arith.constant 0 : i32
    %c0_i32_1 = arith.constant 0 : i32
    return %c0_i32, %c0_i32_0 : i32, i32
  }
  func.func @transform_7(%arg0: i32) -> (i32, i32) {
    %c0_i32 = arith.constant 0 : i32
    %c0_i32_0 = arith.constant 0 : i32
    %c0_i32_1 = arith.constant 0 : i32
    return %c0_i32, %c0_i32_0 : i32, i32
  }
  func.func @transform_8(%arg0: i32) -> (i32, i32) {
    %c0_i32 = arith.constant 0 : i32
    %c0_i32_0 = arith.constant 0 : i32
    %c0_i32_1 = arith.constant 0 : i32
    return %c0_i32, %c0_i32_0 : i32, i32
  }
  func.func @transform_9(%arg0: i32) -> (i32, i32) {
    %c0_i32 = arith.constant 0 : i32
    %c0_i32_0 = arith.constant 0 : i32
    return %c0_i32, %arg0 : i32, i32
  }
}

</mosaic_0001>

<bundles_post_ra>
// kernel: tpu_custom_call.1
= control target key start
LH: loop header
LB: loop body
LE: loop exit
PB: predicated region body
PF: predicated region fallthrough
CT: control target
= control target key end

     0   :  { %s1222_s0 = inlined_call_operand.vmem [shape: f32[128,24], index: 0, kind: input, shape index: {}]   ;;  %s1223_s1 = inlined_call_operand.vmem [shape: f32[128,8], index: 1, kind: input, shape index: {}]   ;;  %s1224_s2 = inlined_call_operand.vmem [shape: bf16[24,32], index: 2, kind: input, shape index: {}]   ;;  %s1225_s3 = inlined_call_operand.vmem [shape: bf16[8,32], index: 3, kind: input, shape index: {}]   ;;  %s1226_s4 = inlined_call_operand.vmem [shape: f32[1,32], index: 4, kind: input, shape index: {}]   ;;  %s1227_s5 = inlined_call_operand.vmem [shape: bf16[32,32], index: 5, kind: input, shape index: {}]   ;;  %s1228_s6 = inlined_call_operand.vmem [shape: f32[1,32], index: 6, kind: input, shape index: {}]   ;;  %s1229_s7 = inlined_call_operand.vmem [shape: f32[1,32], index: 7, kind: input, shape index: {}]   ;;  %s1230_s8 = inlined_call_operand.<no memory space> [shape: f32[1,1], index: 8, kind: input, shape index: {}]   ;;  %s1231_s9 = inlined_call_operand.hbm [shape: f32[1,128], index: 9, kind: output, shape index: {}]  }
   0x1   :  { %v14_v0 = vstv %s1230_s8 }
   0x2   :  { %15 = vst [vmem:[#allocation2] sm:$0x1] %v14_v0 }
   0x3   :  { %v87_v1 = vld [vmem:[%s1225_s3] sm:$0xf]  ;;  %vm113_vm0 = vcmask 1043456   ;;  %v64_v3 = vld [vmem:[%s1223_s1 + $0x8] sm:$0xff]  ;;  %vm88_vm1 = vcmask 64512   ;;  %v65_v6 = vld [vmem:[%s1223_s1 + $0x10] sm:$0xff] }
   0x4   :  { %v63_v2 = vld [vmem:[%s1223_s1] sm:$0xff]  ;;  %937 = vmatprep.subr.msk.bf16.mxu0 %vm113_vm0, %v87_v1  ;;  %v115_v4 = vsel %vm113_vm0, %v87_v1, 0  ;;  %v66_v7 = vld [vmem:[%s1223_s1 + $0x18] sm:$0xff]  ;;  %v68_v11 = vld [vmem:[%s1223_s1 + $0x28] sm:$0xff] }
   0x5   :  { %v79_v5 = vpack.c.bf16 %v64_v3, %v63_v2  ;;  %797 = vmatpush3.bf16.msra.mxu0 %v115_v4  ;;  %v80_v8 = vpack.c.bf16 %v66_v7, %v65_v6  ;;  %v945_v9 = vld [vmem:[%s1224_s2] sm:$0xff]   ;;  %v946_v13 = vld [vmem:[%s1224_s2 + $0x8] ss:$0 sps:$4 sm:$0xff]   ;;  %v69_v14 = vld [vmem:[%s1223_s1 + $0x30] sm:$0xff] }
   0x6   :  { %v67_v10 = vld [vmem:[%s1223_s1 + $0x20] sm:$0xff]  ;;  %814 = vmatprep.subr.bf16.mxu0 %v945_v9  ;;  %v70_v15 = vld [vmem:[%s1223_s1 + $0x38] sm:$0xff]  ;;  %v72_v17 = vld [vmem:[%s1223_s1 + $0x48] sm:$0xff]  ;;  %v249_v18 = vsel %vm113_vm0, %v946_v13, 0 }
   0x7   :  { %798 = vmatprep.mubr.msk.bf16.mxu0 %vm88_vm1, %v79_v5  ;;  %v81_v12 = vpack.c.bf16 %v68_v11, %v67_v10  ;;  %v71_v16 = vld [vmem:[%s1223_s1 + $0x40] sm:$0xff]  ;;  %v82_v19 = vpack.c.bf16 %v70_v15, %v69_v14  ;;  %v73_v21 = vld [vmem:[%s1223_s1 + $0x50] sm:$0xff]  ;;  %v74_v22 = vld [vmem:[%s1223_s1 + $0x58] sm:$0xff] }
   0x8   :  { %799 = vmatmul.mubr.msk.bf16.vlgmr.msra.gmra.mrb[0].mxu0 %vm88_vm1, %v80_v8  ;;  %v83_v20 = vpack.c.bf16 %v72_v17, %v71_v16 }
   0x9   :  { %815 = vmatpush3.bf16.msra.mxu0 %v945_v9  ;;  %802 = vmatprep.mubr.msk.bf16.mxu0 %vm88_vm1, %v81_v12 }
   0xa   :  { %938 = vmatprep.subr.msk.bf16.mxu0 %vm113_vm0, %v946_v13 }
   0xd   :  { %817 = vmatpush3.bf16.msra.mxu0 %v249_v18 }
  0x10   :  { %803 = vmatmul.mubr.msk.bf16.gmra.mrb[4].mxu0 %vm88_vm1, %v82_v19 }
  0x11   :  { %806 = vmatprep.mubr.msk.bf16.mxu0 %vm88_vm1, %v83_v20 }
  0x12   :  { %16 = vsyncpa [#allocation4], 0  ;;  %v75_v23 = vld [vmem:[%s1223_s1 + $0x60] sm:$0xff]  ;;  %v76_v24 = vld [vmem:[%s1223_s1 + $0x68] sm:$0xff]  ;;  %v84_v25 = vpack.c.bf16 %v74_v22, %v73_v21  ;;  %vm223_vm2 = vcmask 195584   ;;  %vm418_vm3 = vcmask 261120  }
  0x13   :  { %v85_v26 = vpack.c.bf16 %v76_v24, %v75_v23  ;;  %v77_v27 = vld [vmem:[%s1223_s1 + $0x70] sm:$0xff]  ;;  %v78_v28 = vld [vmem:[%s1223_s1 + $0x78] sm:$0xff]  ;;  %v36_v29 = vld [vmem:[%s1222_s0] sm:$0xff]  ;;  %vm974_vm4 = vmmov 0   ;;  %s977_s2 = smov [#allocation3]  }
  0x14   :  { %v37_v30 = vld [vmem:[%s1222_s0 + $0x8] sm:$0xff]  ;;  %v86_v31 = vpack.c.bf16 %v78_v28, %v77_v27  ;;  %v38_v33 = vld [vmem:[%s1222_s0 + $0x10] sm:$0xff]  ;;  %v39_v34 = vld [vmem:[%s1222_s0 + $0x18] sm:$0xff]  ;;  %s695_s14 = sshll.u32 %s977_s2, 4  ;;  %s696_s14 = int_to_ptr.vmem [resolvable:$true] %s695_s14 }
  0x15   :  { %v52_v32 = vpack.c.bf16 %v37_v30, %v36_v29  ;;  %v40_v35 = vld [vmem:[%s1222_s0 + $0x20] sm:$0xff]  ;;  %v41_v36 = vld [vmem:[%s1222_s0 + $0x28] sm:$0xff]  ;;  %v53_v37 = vpack.c.bf16 %v39_v34, %v38_v33  ;;  %v42_v39 = vld [vmem:[%s1222_s0 + $0x30] sm:$0xff]  ;;  %s949_s15 = scalar_lea.vmem %s696_s14, 16  ;;  %s953_s16 = scalar_lea.vmem %s696_s14, 32 }
  0x16   :  { %v54_v38 = vpack.c.bf16 %v41_v36, %v40_v35  ;;  %v43_v40 = vld [vmem:[%s1222_s0 + $0x38] sm:$0xff]  ;;  %v44_v41 = vld [vmem:[%s1222_s0 + $0x40] sm:$0xff]  ;;  %v45_v42 = vld [vmem:[%s1222_s0 + $0x48] sm:$0xff]  ;;  %p950_p0 = scmp.ne.s32.totalorder %s696_s14, %s949_s15  ;;  %p954_p1 = scmp.lt.s32.totalorder %s696_s14, %s696_s14 }
  0x17   :  { %v55_v43 = vpack.c.bf16 %v43_v40, %v42_v39  ;;  %v56_v44 = vpack.c.bf16 %v45_v42, %v44_v41  ;;  %v46_v45 = vld [vmem:[%s1222_s0 + $0x50] sm:$0xff]  ;;  %v47_v46 = vld [vmem:[%s1222_s0 + $0x58] sm:$0xff]  ;;  %v48_v47 = vld [vmem:[%s1222_s0 + $0x60] sm:$0xff]  ;;  %p955_p2 = scmp.lt.s32.totalorder %s953_s16, %s949_s15 }
  0x18   :  { %807 = vmatmul.mubr.msk.bf16.gmra.mrb[8].mxu0 %vm88_vm1, %v84_v25  ;;  %v49_v48 = vld [vmem:[%s1222_s0 + $0x68] sm:$0xff]  ;;  %v57_v49 = vpack.c.bf16 %v47_v46, %v46_v45  ;;  %v50_v51 = vld [vmem:[%s1222_s0 + $0x70] sm:$0xff]  ;;  %v51_v52 = vld [vmem:[%s1222_s0 + $0x78] sm:$0xff] }
  0x19   :  { %810 = vmatprep.mubr.msk.bf16.mxu0 %vm88_vm1, %v85_v26  ;;  %v58_v50 = vpack.c.bf16 %v49_v48, %v48_v47  ;;  %v59_v53 = vpack.c.bf16 %v51_v52, %v50_v51  ;;  %v947_v54 = vld [vmem:[%s1227_s5] sm:$0xff]   ;;  %v948_v55 = vld [vmem:[%s1227_s5 + $0x8] sm:$0xff]   ;;  %v976_v52 = vmov 0   ;;  %vm1179_vm5 = vmpackc.low %vm418_vm3, %vm418_vm3  ;;  %p956_p3 = por %p955_p2, %p954_p1 }
  0x1a   :  { %834 = vmatprep.subr.bf16.mxu1 %v947_v54  ;;  %v721_v56 = vld [vmem:[%s1226_s4] ss:$0 sm:$0xff]  ;;  %944 = vset.pattern.permute.xlu0 %v976_v52 }
  0x1b   :  { %835 = vmatpush3.bf16.msra.mxu1 %v947_v54  ;;  %v557_v51 = vld [vmem:[#allocation2] sm:$0x1]  ;;  %p957_p4 = pnand %p956_p3, %p950_p0 }
  0x1c   :  { %836 = vmatprep.subr.bf16.mxu1 %v948_v55  ;;  %560 = vperm.xlu0 %944, %v557_v51  }
  0x1f   :  { %837 = vmatpush3.bf16.msra.mxu1 %v948_v55 }
  0x20   :  { %811 = vmatmul.mubr.msk.bf16.gmra.mrb[12].mxu0 %vm88_vm1, %v86_v31 }
  0x21   :  { %818 = vmatprep.mubr.msk.bf16.mxu0 %vm223_vm2, %v52_v32 }
  0x28   :  { %819 = vmatmul.mubr.msk.bf16.vlgmr.msra.gmra.mrb[0].mxu0 %vm223_vm2, %v53_v37 }
  0x29   :  { %822 = vmatprep.mubr.msk.bf16.mxu0 %vm223_vm2, %v54_v38 }
  0x30   :  { %823 = vmatmul.mubr.msk.bf16.gmra.mrb[4].mxu0 %vm223_vm2, %v55_v43 }
  0x31   :  { %826 = vmatprep.mubr.msk.bf16.mxu0 %vm223_vm2, %v56_v44 }
  0x38   :  { %827 = vmatmul.mubr.msk.bf16.gmra.mrb[8].mxu0 %vm223_vm2, %v57_v49  ;;  %v973_v49 = vmov 0.0|0.0  }
  0x39   :  { %830 = vmatprep.mubr.msk.bf16.mxu0 %vm223_vm2, %v58_v50  ;;  %889 = vmatprep.subr.bf16.mxu1 %v973_v49  ;;  %v975_v50 = vmov 0.0  }
  0x40   :  { %831 = vmatmul.mubr.msk.bf16.gmra.mrb[12].mxu0 %vm223_vm2, %v59_v53  ;;  %v722_v53 = vld [vmem:[%s1228_s6] ss:$0 sm:$0xff] }
  0x9b   :  { %v561_v52 = vpop.permute.xlu0 %560 }
  0xfb   :  { %v820_v57 = vpop.f32.mrb[0].mxu0 }
  0xfc   :  { %v357_v58 = vadd.f32 %v820_v57, %v721_v56  ;;  %v285_v59 = vpop.f32.mrb[1].mxu0 }
  0xfd   :  { %v355_v60 = vadd.f32 %v721_v56, %v285_v59  ;;  %v821_v61 = vpop.f32.mrb[2].mxu0 }
  0xfe   :  { %v358_v62 = vadd.f32 %v821_v61, %v721_v56  ;;  %v288_v63 = vpop.f32.mrb[3].mxu0  ;;  %v373_v1 = vmax.f32 %v357_v58, 0.0 }
  0xff   :  { %v356_v0 = vadd.f32 %v721_v56, %v288_v63  ;;  %v371_v3 = vmax.f32 %v355_v60, 0.0 }
 0x100   :  { %v374_v2 = vmax.f32 %v358_v62, 0.0 }
 0x101   :  { %v372_v4 = vmax.f32 %v356_v0, 0.0 }
 0x102   :  { %v388_v5 = vpack.c.bf16 %v374_v2, %v373_v1 }
 0x103   :  { %v824_v6 = vpop.f32.mrb[4].mxu0  ;;  %v387_v7 = vpack.c.bf16 %v372_v4, %v371_v3 }
 0x104   :  { %v361_v8 = vadd.f32 %v824_v6, %v721_v56  ;;  %v301_v9 = vpop.f32.mrb[5].mxu0 }
 0x105   :  { %v359_v10 = vadd.f32 %v721_v56, %v301_v9  ;;  %v825_v11 = vpop.f32.mrb[6].mxu0  ;;  %838 = vmatprep.mubr.msk.bf16.mxu1 %vm418_vm3, %v387_v7 }
 0x106   :  { %v362_v12 = vadd.f32 %v825_v11, %v721_v56  ;;  %v304_v13 = vpop.f32.mrb[7].mxu0  ;;  %839 = vmatmul.mubr.msk.bf16.vlgmr.msra.gmra.mrb[0].mxu1 %vm418_vm3, %v388_v5  ;;  %v377_v15 = vmax.f32 %v361_v8, 0.0 }
 0x107   :  { %v360_v14 = vadd.f32 %v721_v56, %v304_v13  ;;  %v375_v17 = vmax.f32 %v359_v10, 0.0 }
 0x108   :  { %v378_v16 = vmax.f32 %v362_v12, 0.0 }
 0x109   :  { %v376_v18 = vmax.f32 %v360_v14, 0.0 }
 0x10a   :  { %v390_v19 = vpack.c.bf16 %v378_v16, %v377_v15 }
 0x10b   :  { %v389_v20 = vpack.c.bf16 %v376_v18, %v375_v17  ;;  %v828_v21 = vpop.f32.mrb[8].mxu0 }
 0x10c   :  { %v365_v22 = vadd.f32 %v828_v21, %v721_v56  ;;  %v317_v23 = vpop.f32.mrb[9].mxu0 }
 0x10d   :  { %v363_v24 = vadd.f32 %v721_v56, %v317_v23  ;;  %v829_v25 = vpop.f32.mrb[10].mxu0  ;;  %842 = vmatprep.mubr.msk.bf16.mxu1 %vm418_vm3, %v389_v20 }
 0x10e   :  { %v366_v26 = vadd.f32 %v829_v25, %v721_v56  ;;  %v320_v27 = vpop.f32.mrb[11].mxu0  ;;  %843 = vmatmul.mubr.msk.bf16.gmra.mrb[4].mxu1 %vm418_vm3, %v390_v19  ;;  %v381_v29 = vmax.f32 %v365_v22, 0.0 }
 0x10f   :  { %v364_v28 = vadd.f32 %v721_v56, %v320_v27  ;;  %v379_v31 = vmax.f32 %v363_v24, 0.0 }
 0x110   :  { %v382_v30 = vmax.f32 %v366_v26, 0.0 }
 0x111   :  { %v380_v32 = vmax.f32 %v364_v28, 0.0 }
 0x112   :  { %v392_v33 = vpack.c.bf16 %v382_v30, %v381_v29 }
 0x113   :  { %v391_v34 = vpack.c.bf16 %v380_v32, %v379_v31  ;;  %v832_v35 = vpop.f32.mrb[12].mxu0 }
 0x114   :  { %v369_v36 = vadd.f32 %v832_v35, %v721_v56  ;;  %v333_v37 = vpop.f32.mrb[13].mxu0 }
 0x115   :  { %v367_v38 = vadd.f32 %v721_v56, %v333_v37  ;;  %v833_v39 = vpop.f32.mrb[14].mxu0  ;;  %846 = vmatprep.mubr.msk.bf16.mxu1 %vm418_vm3, %v391_v34 }
 0x116   :  { %v370_v40 = vadd.f32 %v833_v39, %v721_v56  ;;  %v336_v41 = vpop.f32.mrb[15].mxu0  ;;  %847 = vmatmul.mubr.msk.bf16.gmra.mrb[8].mxu1 %vm418_vm3, %v392_v33  ;;  %v385_v43 = vmax.f32 %v369_v36, 0.0 }
 0x117   :  { %v368_v42 = vadd.f32 %v721_v56, %v336_v41  ;;  %v383_v45 = vmax.f32 %v367_v38, 0.0 }
 0x118   :  { %v386_v44 = vmax.f32 %v370_v40, 0.0 }
 0x119   :  { %v384_v46 = vmax.f32 %v368_v42, 0.0 }
 0x11a   :  { %v394_v47 = vpack.c.bf16 %v386_v44, %v385_v43 }
 0x11b   :  { %v393_v48 = vpack.c.bf16 %v384_v46, %v383_v45 }
 0x11d   :  { %850 = vmatprep.mubr.msk.bf16.mxu1 %vm418_vm3, %v393_v48  ;;  %v563_v48 = vlaneseq }
 0x11e   :  { %851 = vmatmul.mubr.msk.bf16.gmra.mrb[12].mxu1 %vm418_vm3, %v394_v47  ;;  %v556_v47 = vld [vmem:[%s1229_s7] sm:$0x1] }
 0x11f   :  { %886 = vmatprep.mubr.msk.f32.mxu1 %vm974_vm4, %v975_v50  ;;  %v564_v50 = vshrl.u32 %v563_v48, 7 }
 0x121   :  { %v565_v51 = vsub.s32 0, %v564_v50 }
 0x1d9   :  { %v840_v54 = vpop.f32.mrb[0].mxu1 }
 0x1da   :  { %v486_v55 = vadd.f32 %v840_v54, %v722_v53  ;;  %v477_v56 = vpop.f32.mrb[1].mxu1 }
 0x1db   :  { %v478_v57 = vadd.f32 %v722_v53, %v477_v56  ;;  %v841_v58 = vpop.f32.mrb[2].mxu1 }
 0x1dc   :  { %v489_v59 = vadd.f32 %v841_v58, %v722_v53  ;;  %v480_v60 = vpop.f32.mrb[3].mxu1  ;;  %v542_v62 = vmax.f32 %v486_v55, 0.0 }
 0x1dd   :  { %v481_v61 = vadd.f32 %v722_v53, %v480_v60  ;;  %v540_v0 = vmax.f32 %v478_v57, 0.0 }
 0x1de   :  { %v543_v63 = vmax.f32 %v489_v59, 0.0 }
 0x1df   :  { %v541_v1 = vmax.f32 %v481_v61, 0.0 }
 0x1e0   :  { %v894_v2 = vpack.c.bf16 %v543_v63, %v542_v62 }
 0x1e1   :  { %v890_v4 = vpack.c.bf16 %v541_v1, %v540_v0  ;;  %v844_v5 = vpop.f32.mrb[4].mxu1 }
 0x1e2   :  { %v502_v6 = vadd.f32 %v844_v5, %v722_v53  ;;  %v493_v7 = vpop.f32.mrb[5].mxu1 }
 0x1e3   :  { %v494_v8 = vadd.f32 %v722_v53, %v493_v7  ;;  %v845_v9 = vpop.f32.mrb[6].mxu1  ;;  %892 = vmatpush3.bf16.xpose.msk.msra.mxu1 %vm1179_vm5, %v890_v4 }
 0x1e4   :  { %v505_v10 = vadd.f32 %v845_v9, %v722_v53  ;;  %v496_v11 = vpop.f32.mrb[7].mxu1  ;;  %893 = vmatprep.subr.bf16.mxu1 %v973_v49  ;;  %v546_v13 = vmax.f32 %v502_v6, 0.0 }
 0x1e5   :  { %v497_v12 = vadd.f32 %v722_v53, %v496_v11  ;;  %v544_v15 = vmax.f32 %v494_v8, 0.0 }
 0x1e6   :  { %v547_v14 = vmax.f32 %v505_v10, 0.0 }
 0x1e7   :  { %v545_v16 = vmax.f32 %v497_v12, 0.0 }
 0x1e8   :  { %v902_v17 = vpack.c.bf16 %v547_v14, %v546_v13 }
 0x1e9   :  { %v898_v18 = vpack.c.bf16 %v545_v16, %v544_v15  ;;  %v848_v19 = vpop.f32.mrb[8].mxu1 }
 0x1ea   :  { %v518_v20 = vadd.f32 %v848_v19, %v722_v53  ;;  %v509_v21 = vpop.f32.mrb[9].mxu1 }
 0x1eb   :  { %v510_v22 = vadd.f32 %v722_v53, %v509_v21  ;;  %v849_v23 = vpop.f32.mrb[10].mxu1  ;;  %896 = vmatpush3.bf16.xpose.msk.msra.mxu1 %vm1179_vm5, %v894_v2 }
 0x1ec   :  { %v521_v24 = vadd.f32 %v849_v23, %v722_v53  ;;  %v512_v25 = vpop.f32.mrb[11].mxu1  ;;  %897 = vmatprep.subr.bf16.mxu1 %v973_v49  ;;  %v550_v27 = vmax.f32 %v518_v20, 0.0 }
 0x1ed   :  { %v513_v26 = vadd.f32 %v722_v53, %v512_v25  ;;  %v548_v29 = vmax.f32 %v510_v22, 0.0 }
 0x1ee   :  { %v551_v28 = vmax.f32 %v521_v24, 0.0 }
 0x1ef   :  { %v549_v30 = vmax.f32 %v513_v26, 0.0 }
 0x1f0   :  { %v910_v31 = vpack.c.bf16 %v551_v28, %v550_v27 }
 0x1f1   :  { %v906_v32 = vpack.c.bf16 %v549_v30, %v548_v29  ;;  %v852_v33 = vpop.f32.mrb[12].mxu1 }
 0x1f2   :  { %v534_v34 = vadd.f32 %v852_v33, %v722_v53  ;;  %v525_v35 = vpop.f32.mrb[13].mxu1 }
 0x1f3   :  { %v526_v36 = vadd.f32 %v722_v53, %v525_v35  ;;  %v853_v37 = vpop.f32.mrb[14].mxu1  ;;  %900 = vmatpush3.bf16.xpose.msk.msra.mxu1 %vm1179_vm5, %v898_v18 }
 0x1f4   :  { %v537_v38 = vadd.f32 %v853_v37, %v722_v53  ;;  %v528_v39 = vpop.f32.mrb[15].mxu1  ;;  %901 = vmatprep.subr.bf16.mxu1 %v973_v49  ;;  %v554_v41 = vmax.f32 %v534_v34, 0.0 }
 0x1f5   :  { %v529_v40 = vadd.f32 %v722_v53, %v528_v39  ;;  %v552_v43 = vmax.f32 %v526_v36, 0.0  ;;  %v566_v53 = vrot.slane %v561_v52, %v565_v51 }
 0x1f6   :  { %v555_v42 = vmax.f32 %v537_v38, 0.0 }
 0x1f7   :  { %v553_v44 = vmax.f32 %v529_v40, 0.0 }
 0x1f8   :  { %v918_v45 = vpack.c.bf16 %v555_v42, %v554_v41 }
 0x1f9   :  { %v914_v46 = vpack.c.bf16 %v553_v44, %v552_v43 }
 0x1fb   :  { %904 = vmatpush3.bf16.xpose.msk.msra.mxu1 %vm1179_vm5, %v902_v17 }
 0x1fc   :  { %905 = vmatprep.subr.bf16.mxu1 %v973_v49 }
 0x203   :  { %908 = vmatpush3.bf16.xpose.msk.msra.mxu1 %vm1179_vm5, %v906_v32 }
 0x204   :  { %909 = vmatprep.subr.bf16.mxu1 %v973_v49 }
 0x20b   :  { %912 = vmatpush3.bf16.xpose.msk.msra.mxu1 %vm1179_vm5, %v910_v31 }
 0x20c   :  { %913 = vmatprep.subr.bf16.mxu1 %v973_v49 }
 0x213   :  { %916 = vmatpush3.bf16.xpose.msk.msra.mxu1 %vm1179_vm5, %v914_v46 }
 0x214   :  { %917 = vmatprep.subr.bf16.mxu1 %v973_v49 }
 0x21b   :  { %920 = vmatpush3.bf16.xpose.msk.msra.mxu1 %vm1179_vm5, %v918_v45 }
 0x222   :  { %887 = vmatmul.mubr.msk.f32.vlgmr.msra.gmra.mrb[16].mxu1 %vm418_vm3, %v556_v47 }
 0x2f5   :  { %v684_v54 = vpop.f32.mrb[16].mxu1 }
 0x2f6   :  { %v685_v55 = vadd.f32 %v684_v54, %v566_v53  ;;  %v888_v56 = vpop.f32.mrb[17].mxu1 }
 0x2f8   :  { %688 = vst [vmem:[#allocation3] sm:$0x1] %v685_v55 }
 0x2f9   :  { %960 = shalt.err (!%p957_p4)
}
 0x2fa   :  { %s961_s17 = scalar_lea.hbm %s1231_s9, 16 }
 0x2fb   :  { %p962_p5 = scmp.ne.s32.totalorder %s1231_s9, %s961_s17  ;;  %p965_p6 = scmp.lt.u32.totalorder %s961_s17, %s1231_s9 }
 0x2fd   :  { %p967_p7 = pnand %p965_p6, %p962_p5 }
 0x2ff   :  { %970 = shalt.err (!%p967_p7)
}
 0x300   :  { %698 = dma.vmem_to_hbm [thread:$0]  %s696_s14, 16, %s1231_s9, [#allocation4]  }
 0x301   :  { %971 = dma.done.wait [#allocation4], 16  }
 0x302   :  { %972 = vsyncadd [#allocation4], 4294967280 }
 0x303   :  { %702 = vsyncpa [#allocation4], 1 }

</bundles_post_ra>
